<compile_context>
chip_gen: v5e
topology: v5e:2x2
jax: 0.10.0
libtpu: 0.0.40
codegen_flags: <defaults>
</compile_context>

<pallas_src>
import jax
import jax.numpy as jnp
from jax.experimental import pallas as pl
from jax.experimental.pallas import tpu as pltpu


# --------------------------------------------------------------------------
# Kernels
# --------------------------------------------------------------------------
def _fused_se_kernel(x_ref, w1_ref, w2_ref, out_ref):
    """One grid step: block_n batch elements, full (C, H*W) plane."""
    x = x_ref[...]                                           # (bn, C, HW), native dtype

    # squeeze: AdaptiveAvgPool2d(1).  1/HW is folded into w1, so a lane-axis
    # sum (XLU) in f32 is all that is needed here.
    pooled = jnp.sum(x.astype(jnp.float32), axis=-1)         # (bn, C) f32

    # excitation: Linear(C, C//r) -> ReLU -> Linear(C//r, C) -> sigmoid (f32)
    z = jnp.maximum(
        jnp.dot(pooled, w1_ref[...], preferred_element_type=jnp.float32), 0.0)
    gate = jax.nn.sigmoid(
        jnp.dot(z, w2_ref[...], preferred_element_type=jnp.float32))  # (bn, C)

    # scale: broadcast per-channel gate over all H*W lanes, native dtype store
    out_ref[...] = x * gate.astype(x.dtype)[:, :, None]


def _make_pool_gate_kernel(hw_total, hw_tile):
    """Pass 1 of the HW-tiled fallback: channel sums over HW tiles -> gate."""
    ragged = (hw_total % hw_tile) != 0

    def kernel(x_ref, w1_ref, w2_ref, gate_ref):
        hw = pl.program_id(1)

        @pl.when(hw == 0)
        def _():
            gate_ref[...] = jnp.zeros_like(gate_ref)

        x = x_ref[...].astype(jnp.float32)                   # (bn, C, hw_tile)
        if ragged:
            lane = jax.lax.broadcasted_iota(jnp.int32, x.shape, x.ndim - 1)
            x = jnp.where(hw * hw_tile + lane < hw_total, x, 0.0)
        gate_ref[0] += jnp.sum(x, axis=-1)                   # partial channel sums

        @pl.when(hw == pl.num_programs(1) - 1)
        def _():
            pooled = gate_ref[0]                             # (bn, C); 1/HW in w1
            z = jnp.maximum(
                jnp.dot(pooled, w1_ref[...],
                        preferred_element_type=jnp.float32), 0.0)
            gate_ref[0] = jax.nn.sigmoid(
                jnp.dot(z, w2_ref[...], preferred_element_type=jnp.float32))

    return kernel


def _apply_gate_kernel(gate_ref, x_ref, out_ref):
    """Pass 2 of the HW-tiled fallback: out = x * gate (per-channel)."""
    x = x_ref[...]                                           # (bn, C, hw_tile)
    g = gate_ref[0].astype(x.dtype)                          # (bn, C)
    out_ref[...] = x * g[:, :, None]


# --------------------------------------------------------------------------
# Wrapper helpers
# --------------------------------------------------------------------------
def _vmem_capacity_bytes():
    """Generation-aware physical VMEM; conservative fallback = v7x per-TC."""
    try:
        cap = int(pltpu.get_tpu_info().vmem_capacity_bytes)
        if cap > 0:
            return cap
    except Exception:
        pass
    return 64 * 1024 * 1024


def _largest_divisor_leq(n, k):
    k = max(1, min(int(k), int(n)))
    for d in range(k, 0, -1):
        if n % d == 0:
            return d
    return 1


def _choose_block_n(n, plane_bytes, max_block_bytes):
    by_budget = max(1, max_block_bytes // plane_bytes)
    # Target >= 4 grid steps (>= 2 for tiny batches) so the DMA pipeline has
    # overlap and v7x's two TensorCores both get work ...
    if n >= 4:
        by_steps = -(-n // 4)
    elif n >= 2:
        by_steps = -(-n // 2)
    else:
        by_steps = 1
    bn = min(by_budget, by_steps)
    # ... but never shrink a block below ~512 KiB just to add steps beyond 2.
    min_useful = max(1, (512 * 1024) // plane_bytes)
    if n >= 2:
        bn = max(bn, min(min_useful, -(-n // 2), by_budget))
    return _largest_divisor_leq(n, bn)


# --------------------------------------------------------------------------
# Forward
# --------------------------------------------------------------------------
def se_block_forward(x_nchw, se_fc1_w, se_fc2_w, *,
                     block_n=None, hw_tile=None, max_block_bytes=None):
    """SE_Block forward.

    x_nchw:   (N, C, H, W), any float dtype (kept native end-to-end)
    se_fc1_w: (C//r, C)  -- nn.Linear(c, c//r, bias=False).weight
    se_fc2_w: (C, C//r)  -- nn.Linear(c//r, c, bias=False).weight
    returns   (N, C, H, W), same dtype as x_nchw
    """
    N, C, H, W = x_nchw.shape
    HW = H * W
    hidden = se_fc1_w.shape[0]
    dtype = x_nchw.dtype
    itemsize = x_nchw.dtype.itemsize

    # Free contiguous view: channels on sublanes, H*W lane-dense last axis.
    # If H*W is not a multiple of 128, the masked tail stores are accepted
    # rather than padding HW in HBM (which would cost an extra pass).
    x3 = x_nchw.reshape(N, C, HW)

    # Fold the 1/HW of the AdaptiveAvgPool mean into the first FC weight.
    w1_k = (jnp.transpose(se_fc1_w) / float(HW)).astype(jnp.float32)   # (C, hidden)
    w2_k = jnp.transpose(se_fc2_w).astype(jnp.float32)                 # (hidden, C)
    weight_bytes = 2 * C * hidden * 4

    vmem_cap = _vmem_capacity_bytes()
    if max_block_bytes is None:
        # ~40% of physical VMEM, split over 4 buffers (in+out, double-buffered).
        max_block_bytes = max(512 * 1024, (vmem_cap * 2 // 5) // 4)

    plane_bytes = C * HW * itemsize

    # ---------------- single fused pass (common case) ----------------
    if plane_bytes <= max_block_bytes:
        if block_n is None:
            block_n = _choose_block_n(N, plane_bytes, max_block_bytes)
        block_n = _largest_divisor_leq(N, max(1, min(block_n, N)))
        num_blocks = N // block_n
        block_bytes = block_n * plane_bytes
        vmem_limit = int(min(vmem_cap,
                             max(4 * block_bytes + 2 * weight_bytes + (4 << 20),
                                 32 << 20)))

        out3 = pl.pallas_call(
            _fused_se_kernel,
            out_shape=jax.ShapeDtypeStruct((N, C, HW), dtype),
            grid_spec=pltpu.PrefetchScalarGridSpec(
                num_scalar_prefetch=0,
                grid=(num_blocks,),
                in_specs=[
                    pl.BlockSpec((block_n, C, HW), lambda n: (n, 0, 0)),
                    pl.BlockSpec((C, hidden), lambda n: (0, 0)),
                    pl.BlockSpec((hidden, C), lambda n: (0, 0)),
                ],
                out_specs=pl.BlockSpec((block_n, C, HW), lambda n: (n, 0, 0)),
            ),
            compiler_params=pltpu.CompilerParams(
                dimension_semantics=("parallel",),
                vmem_limit_bytes=vmem_limit),
        )(x3, w1_k, w2_k)
        return out3.reshape(N, C, H, W)

    # ---------------- two-pass fallback: plane too big for VMEM ----------------
    # TODO(synk): also tile the channel axis when C alone exceeds the budget
    # (only matters for H*W < 128 with extremely large C).
    block_n = 1
    if hw_tile is None:
        hw_tile = max(128, (max_block_bytes // (C * itemsize)) // 128 * 128)
    hw_tile = int(min(hw_tile, HW))
    if hw_tile < HW and hw_tile % 128 != 0:
        hw_tile = min(HW, max(128, hw_tile // 128 * 128))
    num_n = N // block_n
    num_hw = -(-HW // hw_tile)
    tile_bytes = block_n * C * hw_tile * itemsize
    vmem1 = int(min(vmem_cap,
                    max(2 * tile_bytes + 2 * weight_bytes + (4 << 20), 32 << 20)))
    vmem2 = int(min(vmem_cap, max(4 * tile_bytes + (4 << 20), 32 << 20)))

    # Pass 1: per-channel sums over HW tiles, then FC -> sigmoid gate.
    gate = pl.pallas_call(
        _make_pool_gate_kernel(HW, hw_tile),
        out_shape=jax.ShapeDtypeStruct((num_n, block_n, C), jnp.float32),
        grid_spec=pltpu.PrefetchScalarGridSpec(
            num_scalar_prefetch=0,
            grid=(num_n, num_hw),
            in_specs=[
                pl.BlockSpec((block_n, C, hw_tile), lambda n, h: (n, 0, h)),
                pl.BlockSpec((C, hidden), lambda n, h: (0, 0)),
                pl.BlockSpec((hidden, C), lambda n, h: (0, 0)),
            ],
            out_specs=pl.BlockSpec((1, block_n, C), lambda n, h: (n, 0, 0)),
        ),
        compiler_params=pltpu.CompilerParams(
            dimension_semantics=("arbitrary", "arbitrary"),
            vmem_limit_bytes=vmem1),
    )(x3, w1_k, w2_k)

    # Pass 2: apply the gate per (block_n, C, hw_tile) block.
    out3 = pl.pallas_call(
        _apply_gate_kernel,
        out_shape=jax.ShapeDtypeStruct((N, C, HW), dtype),
        grid_spec=pltpu.PrefetchScalarGridSpec(
            num_scalar_prefetch=0,
            grid=(num_n, num_hw),
            in_specs=[
                pl.BlockSpec((1, block_n, C), lambda n, h: (n, 0, 0)),
                pl.BlockSpec((block_n, C, hw_tile), lambda n, h: (n, 0, h)),
            ],
            out_specs=pl.BlockSpec((block_n, C, hw_tile), lambda n, h: (n, 0, h)),
        ),
        compiler_params=pltpu.CompilerParams(
            dimension_semantics=("parallel", "arbitrary"),
            vmem_limit_bytes=vmem2),
    )(gate, x3)

    return out3.reshape(N, C, H, W)


# ---------------- pure-JAX reference (for correctness check) ----------------
def se_block_reference(x, se_fc1_w, se_fc2_w):
    y = jnp.mean(x, axis=(2, 3))                             # (N, C)
    y = jax.nn.relu(y @ se_fc1_w.T)
    y = jax.nn.sigmoid(y @ se_fc2_w.T)
    return x * y[:, :, None, None]


if __name__ == "__main__":
    # Shapes consistent with the module: r=16 default, so pick c=32 -> c//r=2.
    N, C, H, W = 2, 32, 16, 16
    r = 16
    hidden = C // r

    key = jax.random.PRNGKey(0)
    k1, k2, k3 = jax.random.split(key, 3)
    se_fc1_w = 0.1 * jax.random.normal(k1, (hidden, C), jnp.float32)
    se_fc2_w = 0.1 * jax.random.normal(k2, (C, hidden), jnp.float32)
    x = jax.random.normal(k3, (N, C, H, W), jnp.float32)

    ref = jax.block_until_ready(se_block_reference(x, se_fc1_w, se_fc2_w))

    # 1) Fused single-pass path (f32).
    out = jax.block_until_ready(se_block_forward(x, se_fc1_w, se_fc2_w))
    assert out.shape == (N, C, H, W) and out.dtype == x.dtype
    err = float(jnp.max(jnp.abs(out - ref)))
    assert jnp.allclose(out, ref, atol=2e-4, rtol=1e-4), err

    # 2) HW-tiled two-pass fallback path (forced via a tiny block budget).
    out2 = jax.block_until_ready(
        se_block_forward(x, se_fc1_w, se_fc2_w, max_block_bytes=16 * 1024))
    err2 = float(jnp.max(jnp.abs(out2 - ref)))
    assert jnp.allclose(out2, ref, atol=2e-4, rtol=1e-4), err2

    # 3) Native bf16 activations stay bf16 end-to-end (halved HBM traffic).
    x_bf16 = x.astype(jnp.bfloat16)
    out_bf = jax.block_until_ready(se_block_forward(x_bf16, se_fc1_w, se_fc2_w))
    assert out_bf.dtype == jnp.bfloat16
    ref_bf = se_block_reference(x_bf16.astype(jnp.float32), se_fc1_w, se_fc2_w)
    assert jnp.allclose(out_bf.astype(jnp.float32), ref_bf, atol=6e-2, rtol=5e-2)

    print("KERNEL_OK")
</pallas_src>

<mosaic_0001>
module attributes {stable_mosaic.version = 11 : i64} {
  func.func @_fused_se_kernel(%arg0: i32, %arg1: memref<1x32x256xf32, #tpu.memory_space<vmem>>, %arg2: memref<32x2xf32, #tpu.memory_space<vmem>>, %arg3: memref<2x32xf32, #tpu.memory_space<vmem>>, %arg4: memref<1x32x256xf32, #tpu.memory_space<vmem>>) attributes {dimension_semantics = [#tpu.dimension_semantics<parallel>], iteration_bounds = array<i64: 2>, scalar_prefetch = 0 : i64, scratch_operands = 0 : i64, tpu.core_type = #tpu.core_type<tc>, window_params = [{transform_indices = @transform_0, window_bounds = array<i64: 1, 32, 256>}, {pipeline_mode = #tpu.pipeline_mode<synchronous>, transform_indices = @transform_1, window_bounds = array<i64: 32, 2>}, {pipeline_mode = #tpu.pipeline_mode<synchronous>, transform_indices = @transform_2, window_bounds = array<i64: 2, 32>}, {transform_indices = @transform_3, window_bounds = array<i64: 1, 32, 256>}]} {
    %c0 = arith.constant 0 : index
    %c0_0 = arith.constant 0 : index
    %c0_1 = arith.constant 0 : index
    %0 = vector.load %arg1[%c0, %c0_0, %c0_1] : memref<1x32x256xf32, #tpu.memory_space<vmem>>, vector<1x32x256xf32>
    %cst = arith.constant dense<0.000000e+00> : vector<1x32xf32>
    %1 = vector.multi_reduction <add>, %0, %cst [2] : vector<1x32x256xf32> to vector<1x32xf32>
    %c0_2 = arith.constant 0 : index
    %c0_3 = arith.constant 0 : index
    %2 = vector.load %arg2[%c0_2, %c0_3] : memref<32x2xf32, #tpu.memory_space<vmem>>, vector<32x2xf32>
    %cst_4 = arith.constant dense<0.000000e+00> : vector<1x2xf32>
    %3 = tpu.matmul %1, %2, %cst_4 {dimension_numbers = #tpu.dot_dimension_numbers<[1], [0], [0], [1], [0, 0, 1, 1], [], []>} : vector<1x32xf32>, vector<32x2xf32>, vector<1x2xf32> -> vector<1x2xf32>
    %cst_5 = arith.constant 0.000000e+00 : f32
    %4 = vector.broadcast %cst_5 : f32 to vector<1x2xf32>
    %5 = arith.maximumf %3, %4 : vector<1x2xf32>
    %c0_6 = arith.constant 0 : index
    %c0_7 = arith.constant 0 : index
    %6 = vector.load %arg3[%c0_6, %c0_7] : memref<2x32xf32, #tpu.memory_space<vmem>>, vector<2x32xf32>
    %cst_8 = arith.constant dense<0.000000e+00> : vector<1x32xf32>
    %7 = tpu.matmul %5, %6, %cst_8 {dimension_numbers = #tpu.dot_dimension_numbers<[1], [0], [0], [1], [0, 0, 1, 1], [], []>} : vector<1x2xf32>, vector<2x32xf32>, vector<1x32xf32> -> vector<1x32xf32>
    %8 = arith.negf %7 : vector<1x32xf32>
    %9 = math.exp %8 : vector<1x32xf32>
    %cst_9 = arith.constant 1.000000e+00 : f32
    %10 = vector.broadcast %cst_9 : f32 to vector<1x32xf32>
    %11 = arith.addf %10, %9 : vector<1x32xf32>
    %12 = arith.divf %10, %11 : vector<1x32xf32>
    %13 = vector.shape_cast %12 : vector<1x32xf32> to vector<1x32x1xf32>
    %14 = vector.broadcast %13 : vector<1x32x1xf32> to vector<1x32x256xf32>
    %15 = arith.mulf %0, %14 : vector<1x32x256xf32>
    %c0_10 = arith.constant 0 : index
    %c0_11 = arith.constant 0 : index
    %c0_12 = arith.constant 0 : index
    %16 = vector.load %arg4[%c0_10, %c0_11, %c0_12] : memref<1x32x256xf32, #tpu.memory_space<vmem>>, vector<1x32x256xf32>
    tpu.vector_store %arg4[%c0_10, %c0_11, %c0_12], %15 {strides = array<i32>} : memref<1x32x256xf32, #tpu.memory_space<vmem>>, vector<1x32x256xf32>,
    return
  }
  func.func @transform_0(%arg0: i32) -> (i32, i32, i32) {
    %c0_i32 = arith.constant 0 : i32
    %c0_i32_0 = arith.constant 0 : i32
    %c0_i32_1 = arith.constant 0 : i32
    return %arg0, %c0_i32, %c0_i32_0 : i32, i32, i32
  }
  func.func @transform_1(%arg0: i32) -> (i32, i32) {
    %c0_i32 = arith.constant 0 : i32
    %c0_i32_0 = arith.constant 0 : i32
    %c0_i32_1 = arith.constant 0 : i32
    return %c0_i32, %c0_i32_0 : i32, i32
  }
  func.func @transform_2(%arg0: i32) -> (i32, i32) {
    %c0_i32 = arith.constant 0 : i32
    %c0_i32_0 = arith.constant 0 : i32
    %c0_i32_1 = arith.constant 0 : i32
    return %c0_i32, %c0_i32_0 : i32, i32
  }
  func.func @transform_3(%arg0: i32) -> (i32, i32, i32) {
    %c0_i32 = arith.constant 0 : i32
    %c0_i32_0 = arith.constant 0 : i32
    %c0_i32_1 = arith.constant 0 : i32
    return %arg0, %c0_i32, %c0_i32_0 : i32, i32, i32
  }
}

</mosaic_0001>

<bundles_post_ra>
// kernel: tpu_custom_call.1
= control target key start
LH: loop header
LB: loop body
LE: loop exit
PB: predicated region body
PF: predicated region fallthrough
CT: control target
= control target key end

     0   :  { %8 = vsyncpa [#allocation3], 0  ;;  %s815_s0 = inlined_call_operand.hbm [shape: f32[2,32,256], index: 0, kind: input, shape index: {}]   ;;  %s816_s1 = inlined_call_operand.vmem [shape: f32[32,2], index: 1, kind: input, shape index: {}]   ;;  %s817_s2 = inlined_call_operand.vmem [shape: f32[2,32], index: 2, kind: input, shape index: {}]   ;;  %s818_s3 = inlined_call_operand.hbm [shape: f32[2,32,256], index: 3, kind: output, shape index: {}]  }
   0x1   :  { %10 = vsyncpa [#allocation3 + $0x1], 0 }
   0x2   :  { %11 = vsyncpa [#allocation4], 0 }
   0x3   :  { %13 = vsyncpa [#allocation4 + $0x1], 0  ;;  %s637_s12 = smov 0   ;;  %s639_s13 = smov 0  }
   0x4   :  { %s641_s14 = smov 0   ;;  %s643_s15 = smov 0  }
   0x5 LB: > { %s658_s16 = sadd.s32 4294967295, %s611_s15   ;;  %s436_s17 = sadd.s32 4294967294, %s611_s15   ;;  %s611_s15 = sphi %s643_s15, %s828_s15   ;;  %s607_s14 = sphi %s641_s14, %s827_s14   ;;  %s603_s13 = sphi %s639_s13, %s826_s13   ;;  %s599_s12 = sphi %s637_s12, %s825_s12  }
   0x6   : > { %s662_s18 = sadd.s32 1, %s611_s15   ;;  %s26_s19 = sadd.s32 1, %s607_s14 }
   0x7   : > { %s23_s20 = ssub.s32 %s611_s15, %s662_s18  ;;  %p33_p0 = scmp.ne.s32.totalorder %s607_s14, %s603_s13 }
   0x8   : > { %p24_p1 = scmp.eq.s32.totalorder %s23_s20, 0  ;;  %p34_p2 = scmp.eq.s32.totalorder %s611_s15, 0 }
   0x9   : > { %p39_p3 = scmp.ne.s32.totalorder %s603_s13, %s599_s12  ;;  %p40_p4 = scmp.eq.s32.totalorder %s658_s16, 0 }
   0xa   : > { %s674_s21 = scalar_select %p24_p1, %s607_s14, %s26_s19  }
   0xb   : > { %p676_p5 = por %p34_p2, %p33_p0  ;;  %p680_p6 = por %p40_p4, %p39_p3 }
   0xc   : > { %p105_p7 = scmp.eq.s32.totalorder %s658_s16, 1  ;;  %p111_p8 = scmp.eq.s32.totalorder %s436_s17, 1 }
   0xd   : > { %p468_p10 = scmp.lt.s32.totalorder %s611_s15, 2  ;;  %s137_s26 = sand.u32 1, %s607_s14  }
   0xe   : > { %p687_p11 = por %p105_p7, %p33_p0  ;;  %p691_p12 = por %p111_p8, %p39_p3 }
   0xf   : > { %s454_s27 = sshll.u32 %s611_s15, 6  ;;  %s439_s28 = sshll.u32 %s137_s26, 6 }
  0x10   : > { %s146_s4 = scalar_lea.hbm %s815_s0, %s454_s27  ;;  %s141_s6 = scalar_lea.vmem [#allocation2], %s439_s28 }
  0x11   : > { %s147_s5 = sshll.u32 %s146_s4, 4  ;;  %s149_s7 = sshll.u32 %s141_s6, 4  ;;  %s148_s5 = int_to_ptr.hbm [resolvable:$true] %s147_s5  ;;  %s150_s7 = int_to_ptr.vmem [resolvable:$true] %s149_s7 }
  0x12   : > { %p702_p13 = pnand %p468_p10, %p676_p5  ;;  %p442_p0 = scmp.ge.s32.totalorder %s611_s15, 1 }
  0x13   : > { %p157_p1 = scmp.lt.s32.totalorder %s611_s15, 3  ;;  %s138_s9 = scalar_lea.sflag [#allocation3], %s137_s26 }
  0x14   : > { %s515_s10 = sshra.s32 %s148_s5, 4  ;;  %p519_p3 = pneg %p702_p13  ;;  %s516_s10 = int_to_ptr.hbm [resolvable:$true] %s515_s10 }
  0x15   : > { %s517_s11 = scalar_lea.hbm %s516_s10, 64  ;;  %s522_s20 = scalar_lea.hbm %s815_s0, 128 }
  0x16   : > { %p518_p2 = scmp.ne.s32.totalorder %s516_s10, %s517_s11  ;;  %p523_p5 = scmp.lt.s32.totalorder %s516_s10, %s815_s0 }
  0x17   : > { %p524_p8 = scmp.lt.s32.totalorder %s522_s20, %s517_s11 }
  0x18   : > { %p520_p4 = pnand %p519_p3, %p518_p2 }
  0x19   : > { %p525_p10 = por %p524_p8, %p523_p5 }
  0x1a   : > { %p521_p7 = pneg %p520_p4 }
  0x1c   : > { %p526_p9 = pnand %p525_p10, %p521_p7 }
  0x1e   : > { %529 = shalt.err (!%p526_p9)
}
  0x1f   : > { %s613_s26 = smov 256   ;;  %s614_s28 = smov 16  }
  0x20   : > { %463 = dma.hbm_to_vmem [thread:$0]  (!%p702_p13), %s148_s5, 1024, %s150_s7, %s138_s9, %s613_s26, %s613_s26, %s614_s28  }
  0x21   : > { %p158_p2 = pnand %p442_p0, %p157_p1 }
  0x22   : > { %s723_s29 = sand.u32 (!%p158_p2), 1, %s603_s13  }
  0x23   : > { %161 = sbr.rel (%p158_p2) target bundleno = 581 (0x245), region = 32  ;;  %s443_s30 = sshll.u32 (!%p158_p2), %s723_s29, 6 }
  0x24   : > { %s164_s4 = scalar_lea.sflag (!%p158_p2), [#allocation3], %s723_s29  ;;  %s167_s6 = scalar_lea.vmem (!%p158_p2), [#allocation2], %s443_s30 }
  0x28   : > { %590 = dma.done.wait (%p680_p6), %s164_s4, 1024  }
  0x29   : > { %592 = vsyncadd (%p680_p6), %s164_s4, 4294966272  ;;  %v733_v0 = vld [vmem:[%s167_s6] sm:$0xff]  ;;  %v735_v1 = vld [vmem:[%s167_s6 + $0x8] sm:$0xff]  ;;  %v219_v16 = vlaneseq  ;;  %vm224_vm0 = vcmask 130112   ;;  %vm228_vm1 = vcmask 195712   ;;  %vm232_vm2 = vcmask 261312  }
  0x2a   : > { %v737_v2 = vld [vmem:[%s167_s6 + $0x20] sm:$0xff]  ;;  %v199_v3 = vadd.f32 %v735_v1, %v733_v0  ;;  %v741_v4 = vld [vmem:[%s167_s6 + $0x28] sm:$0xff]  ;;  %v745_v6 = vld [vmem:[%s167_s6 + $0x10] sm:$0xff]  ;;  %vm234_vm3 = vcmask 261120   ;;  %vm263_vm4 = vcmask 1041408   ;;  %vm259_vm5 = vcmask 15360  }
  0x2b   : > { %v205_v5 = vadd.f32 %v741_v4, %v737_v2  ;;  %v747_v7 = vld [vmem:[%s167_s6 + $0x18] sm:$0xff]  ;;  %v749_v8 = vld [vmem:[%s167_s6 + $0x30] sm:$0xff]  ;;  %v212_v14 = vld [vmem:[%s816_s1 + $0x8] sm:$0xff]  ;;  %v220_v19 = vand.u32 127, %v219_v16  ;;  %v308_v35 = vshrl.u32 %v219_v16, 7  ;;  %s190_s22 = scalar_lea.vmem [#allocation5], %s443_s30 }
  0x2c   : > { %200 = vadd.xlane.f32.xlu0 %v199_v3  ;;  %v751_v9 = vld [vmem:[%s167_s6 + $0x38] sm:$0xff]  ;;  %v202_v10 = vadd.f32 %v747_v7, %v745_v6  ;;  %v213_v13 = vld [vmem:[%s816_s1 + $0x10] sm:$0xff]  ;;  %v211_v15 = vld [vmem:[%s816_s1] sm:$0xff]  ;;  %s455_s27 = sshll.u32 %s658_s16, 6  ;;  %s360_s6 = sshll.u32 %s190_s22, 4  ;;  %s361_s6 = int_to_ptr.vmem [resolvable:$true] %s360_s6 }
  0x2d   : > { %206 = vadd.xlane.f32.xlu1 %v205_v5  ;;  %v208_v11 = vadd.f32 %v751_v9, %v749_v8  ;;  %v214_v12 = vld [vmem:[%s816_s1 + $0x18] sm:$0xff]  ;;  %v222_v20 = vadd.s32 4294967288, %v220_v19  ;;  %v226_v21 = vadd.s32 4294967280, %v220_v19  ;;  %v230_v22 = vadd.s32 4294967272, %v220_v19  ;;  %v258_v32 = vld [vmem:[%s817_s2] sm:$0x3]  ;;  %506 = vset.pattern.permute.xlu2 %v308_v35  ;;  %s359_s4 = scalar_lea.hbm %s818_s3, %s455_s27 }
  0x2e   : > { %249 = vmatpush.msra.mxu0 %v214_v12  ;;  %446 = vmatpush.msk.msra.mxu1 %vm263_vm4, %v258_v32  ;;  %v327_v36 = vadd.s32 24, %v308_v35  ;;  %v321_v37 = vadd.s32 16, %v308_v35  ;;  %v315_v53 = vadd.s32 8, %v308_v35  ;;  %s362_s23 = sshll.u32 %s359_s4, 4  ;;  %s348_s16 = scalar_lea.sflag [#allocation4], %s723_s29  ;;  %s363_s23 = int_to_ptr.hbm [resolvable:$true] %s362_s23 }
  0x2f   : > { %s559_s30 = sshra.s32 %s363_s23, 4  ;;  %s565_s9 = scalar_lea.hbm %s818_s3, 128  ;;  %s560_s30 = int_to_ptr.hbm [resolvable:$true] %s559_s30 }
  0x30   : > { %250 = vmatpush.msra.mxu0 %v213_v13  ;;  %509 = vset.pattern.permute.xlu1 %v327_v36  ;;  %s561_s5 = scalar_lea.hbm %s560_s30, 64  ;;  %p566_p0 = scmp.lt.s32.totalorder %s560_s30, %s818_s3 }
  0x31   : > { %508 = vset.pattern.permute.xlu0 %v321_v37  ;;  %p562_p6 = scmp.ne.s32.totalorder %s560_s30, %s561_s5  ;;  %p567_p1 = scmp.lt.s32.totalorder %s565_s9, %s561_s5 }
  0x32   : > { %251 = vmatpush.msra.mxu0 %v212_v14 }
  0x33   : > { %p563_p9 = pnand %p562_p6, %p687_p11  ;;  %p568_p3 = por %p567_p1, %p566_p0 }
  0x34   : > { %203 = vadd.xlane.f32.xlu0 %v202_v10  ;;  %252 = vmatpush.msra.mxu0 %v211_v15 }
  0x35   : > { %209 = vadd.xlane.f32.xlu1 %v208_v11  ;;  %p564_p13 = pneg %p563_p9 }
  0x37   : > { %p569_p4 = pnand %p568_p3, %p564_p13 }
  0x9f   : > { %v201_v17 = vpop.xlane.xlu0 %200 }
  0xa0   : > { %v207_v18 = vpop.xlane.xlu1 %206  ;;  %v221_v24 = vperm.slane %v201_v17, %v220_v19 }
  0xa1   : > { %v227_v27 = vperm.slane %v207_v18, %v226_v21 }
  0xa7   : > { %v204_v23 = vpop.xlane.xlu0 %203 }
  0xa8   : > { %v223_v25 = vperm.slane %v204_v23, %v222_v20  ;;  %v210_v26 = vpop.xlane.xlu1 %209 }
  0xa9   : > { %v231_v28 = vperm.slane %v210_v26, %v230_v22 }
  0xaa   : > { %v225_v29 = vsel %vm224_vm0, %v223_v25, %v221_v24 }
  0xab   : > { %v229_v30 = vsel %vm228_vm1, %v227_v27, %v225_v29 }
  0xac   : > { %v233_v31 = vsel %vm232_vm2, %v231_v28, %v229_v30 }
  0xad   : > { %445 = vmatmul.msk.f32.vlgmr.msra.gmra.mxu0 %vm234_vm3, %v233_v31 }
 0x12a   : > { %v254_v33 = vpop.f32.mrf.mxu0 }
 0x12b   : > { %v257_v34 = vmax.f32 %v254_v33, 0.0 }
 0x12d   : > { %447 = vmatmul.msk.f32.vlgmr.msra.gmra.mxu1 %vm259_vm5, %v257_v34 }
 0x1aa   : > { %v284_v38 = vpop.f32.mrf.mxu1 }
 0x1ab   : > { %v448_v39 = vmul.f32 -1.442695, %v284_v38 }
 0x1ad   : > { %511 = vpow2.f32 %v448_v39 }
 0x1b3   : > { %v512_v40 = vpop.eup %511 }
 0x1b4   : > { %v290_v41 = vadd.f32 1.0, %v512_v40 }
 0x1b6   : > { %513 = vrcp.f32 %v290_v41  ;;  %v302_v45 = vand.u32 2147483648, %v290_v41  ;;  %v300_v47 = vand.u32 2147483647, %v290_v41  ;;  %vm296_vm7 = vweird.f32 %v290_v41 }
 0x1b8   : > { %v303_v49 = vor.u32 1.1754944e-38, %v302_v45  ;;  %vm301_vm9 = vcmp.eq.f32.partialorder %v300_v47, 8.507059e+37 }
 0x1bc   : > { %v514_v42 = vpop.eup %513 }
 0x1bd   : > { %v292_v43 = vmul.f32 %v514_v42, %v290_v41  ;;  %vm297_vm6 = vweird.f32 %v514_v42 }
 0x1be   : > { %vm298_vm8 = vmor %vm296_vm7, %vm297_vm6 }
 0x1bf   : > { %v293_v44 = vsub.f32 1.0, %v292_v43 }
 0x1c1   : > { %v294_v46 = vmul.f32 %v514_v42, %v293_v44 }
 0x1c3   : > { %v295_v48 = vadd.f32 %v514_v42, %v294_v46 }
 0x1c5   : > { %v299_v50 = vsel %vm298_vm8, %v514_v42, %v295_v48 }
 0x1c6   : > { %v304_v51 = vsel %vm301_vm9, %v303_v49, %v299_v50 }
 0x1c7   : > { %v306_v52 = vperm.slane %v304_v51, 0 }
 0x1c9   : > { %329 = vperm.xlu1 %509, %v306_v52   ;;  %323 = vperm.xlu0 %508, %v306_v52  }
 0x1ca   : > { %311 = vperm.xlu2 %506, %v306_v52  }
 0x1d1   : > { %510 = vset.pattern.permute.xlu0 %v327_v36 }
 0x1d2   : > { %507 = vset.pattern.permute.xlu2 %v315_v53 }
 0x1da   : > { %317 = vperm.xlu2 %507, %v306_v52  }
 0x224   : > { %v312_v54 = vpop.permute.xlu2 %311 }
 0x225   : > { %v331_v55 = vmul.f32 %v312_v54, %v733_v0  ;;  %v332_v56 = vmul.f32 %v312_v54, %v735_v1 }
 0x227   : > { %339 = vst [vmem:[%s190_s22] sm:$0xff] %v331_v55 }
 0x228   : > { %340 = vst [vmem:[%s190_s22 + $0x8] sm:$0xff] %v332_v56 }
 0x234   : > { %v318_v57 = vpop.permute.xlu2 %317 }
 0x235   : > { %v333_v58 = vmul.f32 %v318_v57, %v745_v6  ;;  %v334_v59 = vmul.f32 %v318_v57, %v747_v7 }
 0x237   : > { %341 = vst [vmem:[%s190_s22 + $0x10] sm:$0xff] %v333_v58 }
 0x238   : > { %342 = vst [vmem:[%s190_s22 + $0x18] sm:$0xff] %v334_v59 }
 0x23b   : > { %v330_v60 = vpop.permute.xlu1 %329  ;;  %v324_v61 = vpop.permute.xlu0 %323 }
 0x23c   : > { %v337_v62 = vmul.f32 %v330_v60, %v749_v8  ;;  %v338_v63 = vmul.f32 %v330_v60, %v751_v9  ;;  %v335_v0 = vmul.f32 %v324_v61, %v737_v2  ;;  %v336_v1 = vmul.f32 %v324_v61, %v741_v4 }
 0x23e   : > { %345 = vst [vmem:[%s190_s22 + $0x30] sm:$0xff] %v337_v62 }
 0x23f   : > { %346 = vst [vmem:[%s190_s22 + $0x38] sm:$0xff] %v338_v63 }
 0x240   : > { %343 = vst [vmem:[%s190_s22 + $0x20] sm:$0xff] %v335_v0 }
 0x241   : > { %344 = vst [vmem:[%s190_s22 + $0x28] sm:$0xff] %v336_v1 }
 0x242   : > { %572 = shalt.err (!%p569_p4)
}
 0x243   : > { %s615_s29 = smov 256   ;;  %s616_s17 = smov 16  }
 0x244   : > { %458 = dma.vmem_to_hbm [thread:$0]  (%p687_p11), %s361_s6, 1024, %s363_s23, %s348_s16, %s615_s29, %s615_s29, %s616_s17  }
 0x245 PF: > { %s377_s19 = sand.u32 1, %s599_s12   ;;  %p824_p7 = scmp.ge.s32.totalorder %s611_s15, 2 }
 0x246   : > { %s378_s20 = scalar_lea.sflag [#allocation4], %s377_s19 }
 0x247   : > { %p465_p5 = pnand %p824_p7, %p691_p12 }
 0x249   : > { %p466_p8 = pneg %p465_p5 }
 0x24b   : > { %594 = dma.done.wait (%p466_p8), %s378_s20, 1024  }
 0x24c   : > { %596 = vsyncadd (%p466_p8), %s378_s20, 4294966272  ;;  %p16_p10 = scmp.ge.s32.totalorder %s662_s18, 4   ;;  %s825_s12 = smov %s603_s13 }
 0x24d   : > { %s826_s13 = smov %s607_s14  ;;  %s827_s14 = smov %s674_s21 }
 0x24e   : > { %s828_s15 = smov %s662_s18  ;;  %18 = sbr.rel (!%p16_p10) target bundleno = 5 (0x5), region = 77 }
 0x253   :  { %384 = vsyncpa [#allocation3], 1 }
 0x254   :  { %386 = vsyncpa [#allocation3 + $0x1], 1 }
 0x255   :  { %387 = vsyncpa [#allocation4], 1 }
 0x256   :  { %389 = vsyncpa [#allocation4 + $0x1], 1 }

</bundles_post_ra>
